<compile_context>
chip_gen: v5e
topology: v5e:2x2
jax: 0.10.0
libtpu: 0.0.40
codegen_flags: <defaults>
</compile_context>

<pallas_src>
import functools

import jax
import jax.numpy as jnp
from jax import lax
from jax.experimental import pallas as pl
from jax.experimental.pallas import tpu as pltpu


def rmsnorm_kernel(x_ref, g_ref, o_ref, *, eps, inv_d):
    # x_ref: (R, Dp) row tile; g_ref: (1, Dp) f32 gain (resident); o_ref: (R, Dp).
    x = x_ref[...].astype(jnp.float32)                    # compute in fp32 per spec
    g = g_ref[...]                                        # already f32 in wrapper
    # sum/d_true (not mean over the possibly lane-padded width).
    ms = jnp.sum(x * x, axis=-1, keepdims=True) * inv_d   # (R, 1) lane reduce -> XLU
    inv = lax.rsqrt(ms + eps)                             # EUP slot
    o_ref[...] = (x * inv * g).astype(o_ref.dtype)        # cast back to input dtype


def _round_up(a, b):
    return (a + b - 1) // b * b


def rmsnorm_forward(x, gain, eps: float = 1e-5):
    """RMSNorm over the last axis of x. x: (..., d_model); gain: (d_model,)."""
    orig_shape = x.shape
    orig_dtype = x.dtype
    d = orig_shape[-1]
    assert gain.shape == (d,), "gain must be (d_model,)"

    xf = x.reshape(-1, d)
    n = xf.shape[0]

    # Lane-dense feature axis: only pad when d is not already a multiple of 128.
    d_pad = _round_up(d, 128)
    if d_pad != d:
        xf = jnp.pad(xf, ((0, 0), (0, d_pad - d)))
        g2 = jnp.pad(gain.astype(jnp.float32), (0, d_pad - d)).reshape(1, d_pad)
    else:
        g2 = gain.astype(jnp.float32).reshape(1, d_pad)

    # Dtype-aware row tile: ~4 MiB of the input dtype per x block, multiple of
    # 8 sublanes.  (f32 in-kernel temporaries then stay <= ~8 MiB per block.)
    itemsize = jnp.dtype(orig_dtype).itemsize
    target_block_bytes = 4 * 1024 * 1024
    tile_rows = max(8, (target_block_bytes // (d_pad * itemsize)) // 8 * 8)
    tile_rows = min(tile_rows, _round_up(n, 8))

    # Prefer >= 8 grid steps: shards across both v7x TensorCores with enough
    # steps per core to overlap DMA with compute/writeback.
    min_steps = 8
    if pl.cdiv(n, tile_rows) < min_steps:
        tile_rows = max(8, _round_up(pl.cdiv(n, min_steps), 8))

    grid = (pl.cdiv(n, tile_rows),)  # partial last block handled by Pallas masking

    out = pl.pallas_call(
        functools.partial(rmsnorm_kernel, eps=float(eps), inv_d=1.0 / float(d)),
        out_shape=jax.ShapeDtypeStruct((n, d_pad), orig_dtype),
        grid=grid,
        in_specs=[
            pl.BlockSpec((tile_rows, d_pad), lambda i: (i, 0)),  # x rows
            pl.BlockSpec((1, d_pad), lambda i: (0, 0)),          # gain (resident)
        ],
        out_specs=pl.BlockSpec((tile_rows, d_pad), lambda i: (i, 0)),
        compiler_params=pltpu.CompilerParams(
            dimension_semantics=("parallel",),
            vmem_limit_bytes=48 << 20,  # above 16/32 MiB scoped defaults, < 64 MiB v7x physical
        ),
    )(xf, g2)

    if d_pad != d:
        out = out[:, :d]
    return out.reshape(orig_shape)


def rmsnorm_reference(x, gain, eps: float = 1e-5):
    """Pure-JAX mirror of the PyTorch forward, for verification."""
    x32 = x.astype(jnp.float32)
    rms = jnp.sqrt(jnp.mean(x32 * x32, axis=-1, keepdims=True) + eps)
    y = x32 / rms * gain.astype(jnp.float32)
    return y.astype(x.dtype)


if __name__ == "__main__":
    key = jax.random.PRNGKey(0)
    k1, k2, k3, k4 = jax.random.split(key, 4)

    # Case 1: lane-dense d_model (multiple of 128), f32.  batch=2, seq=8, hidden=128.
    B, S, D = 2, 8, 128
    x = jax.random.normal(k1, (B, S, D), dtype=jnp.float32)
    gain = 1.0 + 0.1 * jax.random.normal(k2, (D,), dtype=jnp.float32)
    out = jax.block_until_ready(rmsnorm_forward(x, gain, eps=1e-5))
    ref = rmsnorm_reference(x, gain, eps=1e-5)
    assert out.shape == x.shape and out.dtype == x.dtype
    assert jnp.allclose(out, ref, atol=1e-5, rtol=1e-5), "case 1 mismatch"

    # Case 2: small, non-aligned shapes (ragged rows = 15, d = 32 -> lane-pad path).
    B2, S2, D2 = 3, 5, 32
    x2 = jax.random.normal(k3, (B2, S2, D2), dtype=jnp.float32)
    gain2 = jnp.ones((D2,), dtype=jnp.float32)  # module's init value
    out2 = jax.block_until_ready(rmsnorm_forward(x2, gain2, eps=1e-5))
    ref2 = rmsnorm_reference(x2, gain2, eps=1e-5)
    assert out2.shape == x2.shape and out2.dtype == x2.dtype
    assert jnp.allclose(out2, ref2, atol=1e-5, rtol=1e-5), "case 2 mismatch"

    # Case 3: bf16 input/output (dtype-aware tiling path, cast-back semantics).
    B3, S3, D3 = 2, 16, 128
    x3 = jax.random.normal(k4, (B3, S3, D3), dtype=jnp.float32).astype(jnp.bfloat16)
    gain3 = 1.0 + 0.1 * jax.random.normal(k2, (D3,), dtype=jnp.float32)
    out3 = jax.block_until_ready(rmsnorm_forward(x3, gain3, eps=1e-5))
    ref3 = rmsnorm_reference(x3, gain3, eps=1e-5)
    assert out3.shape == x3.shape and out3.dtype == x3.dtype
    assert jnp.allclose(out3.astype(jnp.float32), ref3.astype(jnp.float32),
                        atol=5e-2, rtol=5e-2), "case 3 mismatch"

    print("KERNEL_OK")
</pallas_src>

<mosaic_0001>
module attributes {stable_mosaic.version = 11 : i64} {
  func.func @rmsnorm_kernel(%arg0: i32, %arg1: memref<8x128xf32, #tpu.memory_space<vmem>>, %arg2: memref<1x128xf32, #tpu.memory_space<vmem>>, %arg3: memref<8x128xf32, #tpu.memory_space<vmem>>) attributes {dimension_semantics = [#tpu.dimension_semantics<parallel>], iteration_bounds = array<i64: 2>, scalar_prefetch = 0 : i64, scratch_operands = 0 : i64, tpu.core_type = #tpu.core_type<tc>, window_params = [{transform_indices = @transform_0, window_bounds = array<i64: 8, 128>}, {pipeline_mode = #tpu.pipeline_mode<synchronous>, transform_indices = @transform_1, window_bounds = array<i64: 1, 128>}, {transform_indices = @transform_2, window_bounds = array<i64: 8, 128>}]} {
    %c0 = arith.constant 0 : index
    %c0_0 = arith.constant 0 : index
    %0 = vector.load %arg1[%c0, %c0_0] : memref<8x128xf32, #tpu.memory_space<vmem>>, vector<8x128xf32>
    %c0_1 = arith.constant 0 : index
    %c0_2 = arith.constant 0 : index
    %1 = vector.load %arg2[%c0_1, %c0_2] : memref<1x128xf32, #tpu.memory_space<vmem>>, vector<1x128xf32>
    %2 = arith.mulf %0, %0 : vector<8x128xf32>
    %cst = arith.constant dense<0.000000e+00> : vector<8xf32>
    %3 = vector.multi_reduction <add>, %2, %cst [1] : vector<8x128xf32> to vector<8xf32>
    %4 = vector.shape_cast %3 : vector<8xf32> to vector<8x1xf32>
    %cst_3 = arith.constant 7.812500e-03 : f32
    %5 = vector.broadcast %cst_3 : f32 to vector<8x1xf32>
    %6 = arith.mulf %4, %5 : vector<8x1xf32>
    %cst_4 = arith.constant 9.99999974E-6 : f32
    %7 = vector.broadcast %cst_4 : f32 to vector<8x1xf32>
    %8 = arith.addf %6, %7 : vector<8x1xf32>
    %9 = math.rsqrt %8 : vector<8x1xf32>
    %10 = vector.broadcast %9 : vector<8x1xf32> to vector<8x128xf32>
    %11 = arith.mulf %0, %10 : vector<8x128xf32>
    %12 = vector.broadcast %1 : vector<1x128xf32> to vector<8x128xf32>
    %13 = arith.mulf %11, %12 : vector<8x128xf32>
    %c0_5 = arith.constant 0 : index
    %c0_6 = arith.constant 0 : index
    %14 = vector.load %arg3[%c0_5, %c0_6] : memref<8x128xf32, #tpu.memory_space<vmem>>, vector<8x128xf32>
    tpu.vector_store %arg3[%c0_5, %c0_6], %13 {strides = array<i32>} : memref<8x128xf32, #tpu.memory_space<vmem>>, vector<8x128xf32>,
    return
  }
  func.func @transform_0(%arg0: i32) -> (i32, i32) {
    %c0_i32 = arith.constant 0 : i32
    %c0_i32_0 = arith.constant 0 : i32
    return %arg0, %c0_i32 : i32, i32
  }
  func.func @transform_1(%arg0: i32) -> (i32, i32) {
    %c0_i32 = arith.constant 0 : i32
    %c0_i32_0 = arith.constant 0 : i32
    %c0_i32_1 = arith.constant 0 : i32
    return %c0_i32, %c0_i32_0 : i32, i32
  }
  func.func @transform_2(%arg0: i32) -> (i32, i32) {
    %c0_i32 = arith.constant 0 : i32
    %c0_i32_0 = arith.constant 0 : i32
    return %arg0, %c0_i32 : i32, i32
  }
}

</mosaic_0001>

<bundles_post_ra>
// kernel: tpu_custom_call.1
= control target key start
LH: loop header
LB: loop body
LE: loop exit
PB: predicated region body
PF: predicated region fallthrough
CT: control target
= control target key end

     0   :  { %7 = vsyncpa [#allocation3], 0  ;;  %s655_s0 = inlined_call_operand.hbm [shape: f32[16,128], index: 0, kind: input, shape index: {}]   ;;  %s656_s1 = inlined_call_operand.hbm [shape: f32[1,128], index: 1, kind: input, shape index: {}]   ;;  %s657_s2 = inlined_call_operand.hbm [shape: f32[16,128], index: 2, kind: output, shape index: {}]  }
   0x1   :  { %9 = vsyncpa [#allocation3 + $0x1], 0 }
   0x2   :  { %10 = vsyncpa [#allocation6], 0 }
   0x3   :  { %11 = vsyncpa [#allocation4], 0 }
   0x4   :  { %13 = vsyncpa [#allocation4 + $0x1], 0  ;;  %s517_s9 = smov 0   ;;  %s519_s10 = smov 0  }
   0x5   :  { %s521_s11 = smov 0   ;;  %s523_s12 = smov 0  }
   0x6 LB: > { %s538_s13 = sadd.s32 4294967295, %s499_s12   ;;  %s295_s14 = sadd.s32 4294967294, %s499_s12   ;;  %s499_s12 = sphi %s523_s12, %s667_s12   ;;  %s495_s11 = sphi %s521_s11, %s666_s11   ;;  %s491_s10 = sphi %s519_s10, %s665_s10   ;;  %s487_s9 = sphi %s517_s9, %s664_s9  }
   0x7   : > { %p39_p0 = scmp.ne.s32.totalorder %s491_s10, %s487_s9  ;;  %p40_p1 = scmp.eq.s32.totalorder %s538_s13, 0 }
   0x8   : > { %p84_p2 = scmp.eq.s32.totalorder %s538_s13, 1  ;;  %p90_p3 = scmp.eq.s32.totalorder %s295_s14, 1 }
   0x9   : > { %p547_p4 = por %p40_p1, %p39_p0  ;;  %p296_p5 = scmp.ge.s32.totalorder %s499_s12, 1 }
   0xa   : > { %p552_p6 = por %p90_p3, %p39_p0  ;;  %p97_p7 = scmp.lt.s32.totalorder %s499_s12, 3 }
   0xb   : > { %s109_s19 = sshll.u32 %s656_s1, 4  ;;  %s501_s21 = smov [#allocation5]   ;;  %s110_s19 = int_to_ptr.hbm [resolvable:$true] %s109_s19 }
   0xc   : > { %p560_p8 = pnand %p296_p5, %p97_p7  ;;  %s111_s22 = sshll.u32 %s501_s21, 4  ;;  %s112_s22 = int_to_ptr.vmem [resolvable:$true] %s111_s22 }
   0xd   : > { %s570_s23 = sadd.s32 1, %s499_s12   ;;  %s26_s24 = sadd.s32 1, %s495_s11 }
   0xe   : > { %p317_p10 = pneg %p560_p8  ;;  %s23_s25 = ssub.s32 %s499_s12, %s570_s23 }
   0xf   : > { %p24_p12 = scmp.eq.s32.totalorder %s23_s25, 0  ;;  %p33_p13 = scmp.ne.s32.totalorder %s495_s11, %s491_s10 }
  0x10   : > { %p318_p11 = pnand %p317_p10, %p40_p1  ;;  %p34_p0 = scmp.eq.s32.totalorder %s499_s12, 0 }
  0x11   : > { %s579_s26 = scalar_select %p24_p12, %s495_s11, %s26_s24  }
  0x12   : > { %320 = dma.hbm_to_vmem [thread:$0]  (!%p318_p11), %s110_s19, 16, %s112_s22, [#allocation6]  }
  0x13   : > { %p583_p3 = por %p84_p2, %p33_p13  ;;  %p330_p5 = scmp.lt.s32.totalorder %s499_s12, 2 }
  0x14   : > { %s122_s28 = sand.u32 1, %s495_s11   ;;  %s300_s29 = sshll.u32 %s499_s12, 3 }
  0x15   : > { %p35_p7 = por %p34_p0, %p33_p13  ;;  %s299_s30 = sshll.u32 %s122_s28, 3 }
  0x16   : > { %s130_s5 = scalar_lea.hbm %s655_s0, %s300_s29  ;;  %s126_s7 = scalar_lea.vmem [#allocation2], %s299_s30 }
  0x17   : > { %s132_s6 = sshll.u32 %s130_s5, 4  ;;  %s134_s8 = sshll.u32 %s126_s7, 4  ;;  %s133_s6 = int_to_ptr.hbm [resolvable:$true] %s132_s6  ;;  %s135_s8 = int_to_ptr.vmem [resolvable:$true] %s134_s8 }
  0x18   : > { %p593_p10 = pnand %p330_p5, %p35_p7  ;;  %s123_s17 = scalar_lea.sflag [#allocation3], %s122_s28 }
  0x19   : > { %s399_s18 = sshra.s32 %s133_s6, 4  ;;  %s406_s24 = scalar_lea.hbm %s655_s0, 16  ;;  %s400_s18 = int_to_ptr.hbm [resolvable:$true] %s399_s18 }
  0x1a   : > { %s401_s19 = scalar_lea.hbm %s400_s18, 8  ;;  %p403_p11 = pneg %p593_p10 }
  0x1b   : > { %p402_p2 = scmp.ne.s32.totalorder %s400_s18, %s401_s19  ;;  %p407_p0 = scmp.lt.s32.totalorder %s400_s18, %s655_s0 }
  0x1c   : > { %p408_p5 = scmp.lt.s32.totalorder %s406_s24, %s401_s19 }
  0x1d   : > { %p404_p12 = pnand %p403_p11, %p402_p2 }
  0x1e   : > { %p409_p7 = por %p408_p5, %p407_p0 }
  0x1f   : > { %p405_p13 = pneg %p404_p12 }
  0x21   : > { %p410_p9 = pnand %p409_p7, %p405_p13 }
  0x23   : > { %413 = shalt.err (!%p410_p9)
}
  0x24   : > { %324 = dma.hbm_to_vmem [thread:$0]  (!%p593_p10), %s133_s6, 128, %s135_s8, %s123_s17  }
  0x25   : > { %143 = sbr.rel (%p560_p8) target bundleno = 193 (0xc1), region = 28  ;;  %s610_s28 = sand.u32 (!%p560_p8), 1, %s491_s10  }
  0x26   : > { %s302_s30 = sshll.u32 (!%p560_p8), %s610_s28, 3  ;;  %s146_s3 = scalar_lea.sflag (!%p560_p8), [#allocation3], %s610_s28 }
  0x27   : > { %s149_s4 = scalar_lea.vmem (!%p560_p8), [#allocation2], %s302_s30 }
  0x2a   : > { %474 = dma.done.wait (%p547_p4), %s146_s3, 128  }
  0x2b   : > { %476 = vsyncadd (%p547_p4), %s146_s3, 4294967168 }
  0x2c   : > { %478 = dma.done.wait (%p40_p1), [#allocation6], 16  }
  0x2d   : > { %480 = vsyncadd (%p40_p1), [#allocation6], 4294967280  ;;  %v176_v0 = vld [vmem:[%s149_s4] sm:$0xff]  ;;  %s306_s15 = sshll.u32 %s538_s13, 3  ;;  %v366_v11 = vld [vmem:[#allocation5] ss:$0 sm:$0xff] }
  0x2e   : > { %v178_v1 = vmul.f32 %v176_v0, %v176_v0  ;;  %s210_s6 = scalar_lea.hbm %s657_s2, %s306_s15  ;;  %s175_s7 = scalar_lea.vmem [#allocation7], %s302_s30 }
  0x2f   : > { %s212_s8 = sshll.u32 %s175_s7, 4  ;;  %s214_s14 = sshll.u32 %s210_s6, 4  ;;  %s213_s8 = int_to_ptr.vmem [resolvable:$true] %s212_s8  ;;  %s215_s14 = int_to_ptr.hbm [resolvable:$true] %s214_s14 }
  0x30   : > { %179 = vadd.xlane.f32.xlu0 %v178_v1  ;;  %s200_s13 = scalar_lea.sflag [#allocation4], %s610_s28  ;;  %s443_s17 = sshra.s32 %s215_s14, 4  ;;  %s444_s17 = int_to_ptr.hbm [resolvable:$true] %s443_s17 }
  0x31   : > { %s445_s18 = scalar_lea.hbm %s444_s17, 8  ;;  %s449_s22 = scalar_lea.hbm %s657_s2, 16 }
  0x32   : > { %p446_p1 = scmp.ne.s32.totalorder %s444_s17, %s445_s18  ;;  %p450_p9 = scmp.lt.s32.totalorder %s444_s17, %s657_s2 }
  0x33   : > { %p451_p10 = scmp.lt.s32.totalorder %s449_s22, %s445_s18 }
  0x34   : > { %p447_p4 = pnand %p446_p1, %p583_p3 }
  0x35   : > { %p452_p2 = por %p451_p10, %p450_p9 }
  0x36   : > { %p448_p8 = pneg %p447_p4 }
  0x38   : > { %p453_p11 = pnand %p452_p2, %p448_p8 }
  0xa3   : > { %v180_v2 = vpop.xlane.xlu0 %179 }
  0xa4   : > { %v181_v3 = vmul.f32 0.0078125, %v180_v2 }
  0xa6   : > { %v182_v4 = vadd.f32 1e-05, %v181_v3 }
  0xa8   : > { %367 = vrsqrt.f32 %v182_v4  ;;  %vm189_vm1 = vweird.f32 %v182_v4 }
  0xae   : > { %v368_v5 = vpop.eup %367 }
  0xaf   : > { %v184_v6 = vmul.f32 %v368_v5, %v182_v4  ;;  %vm190_vm0 = vweird.f32 %v368_v5 }
  0xb0   : > { %vm191_vm2 = vmor %vm189_vm1, %vm190_vm0 }
  0xb1   : > { %v185_v7 = vmul.f32 %v368_v5, %v184_v6 }
  0xb3   : > { %v186_v8 = vmul.f32 0.5, %v185_v7 }
  0xb5   : > { %v187_v9 = vsub.f32 1.5, %v186_v8 }
  0xb7   : > { %v188_v10 = vmul.f32 %v368_v5, %v187_v9 }
  0xb9   : > { %v192_v12 = vsel %vm191_vm2, %v368_v5, %v188_v10 }
  0xba   : > { %v193_v13 = vmul.f32 %v192_v12, %v176_v0 }
  0xbc   : > { %v197_v14 = vmul.f32 %v366_v11, %v193_v13 }
  0xbe   : > { %198 = vst [vmem:[%s175_s7] sm:$0xff] %v197_v14 }
  0xbf   : > { %456 = shalt.err (!%p453_p11)
}
  0xc0   : > { %315 = dma.vmem_to_hbm [thread:$0]  (%p583_p3), %s213_s8, 128, %s215_s14, %s200_s13  }
  0xc1 PF: > { %s226_s29 = sand.u32 1, %s487_s9   ;;  %p663_p12 = scmp.ge.s32.totalorder %s499_s12, 2 }
  0xc2   : > { %s227_s28 = scalar_lea.sflag [#allocation4], %s226_s29 }
  0xc3   : > { %p326_p13 = pnand %p663_p12, %p552_p6 }
  0xc5   : > { %p327_p0 = pneg %p326_p13 }
  0xc7   : > { %482 = dma.done.wait (%p327_p0), %s227_s28, 128  }
  0xc8   : > { %484 = vsyncadd (%p327_p0), %s227_s28, 4294967168  ;;  %p16_p5 = scmp.ge.s32.totalorder %s570_s23, 4   ;;  %s664_s9 = smov %s491_s10 }
  0xc9   : > { %s665_s10 = smov %s495_s11  ;;  %s666_s11 = smov %s579_s26 }
  0xca   : > { %s667_s12 = smov %s570_s23  ;;  %18 = sbr.rel (!%p16_p5) target bundleno = 6 (0x6), region = 77 }
  0xcf   :  { %233 = vsyncpa [#allocation3], 1 }
  0xd0   :  { %235 = vsyncpa [#allocation3 + $0x1], 1 }
  0xd1   :  { %236 = vsyncpa [#allocation6], 1 }
  0xd2   :  { %237 = vsyncpa [#allocation4], 1 }
  0xd3   :  { %239 = vsyncpa [#allocation4 + $0x1], 1 }

</bundles_post_ra>
